<compile_context>
chip_gen: v6e
topology: v6e:2x2x1
jax: 0.10.0
libtpu: 0.0.40
codegen_flags: <defaults>
</compile_context>

<pallas_src>
import numpy as np
import jax
import jax.numpy as jnp
from jax.experimental import pallas as pl
from jax.experimental.pallas import tpu as pltpu


def _round_down(v, m):
    return max(m, (v // m) * m)


def _vmem_capacity_bytes():
    """Best-effort per-core VMEM query; conservative 64 MiB (v7x) fallback."""
    try:
        info = pltpu.get_tpu_info()
        cap = getattr(info, "vmem_capacity_bytes", None)
        if cap:
            return int(cap)
    except Exception:
        pass
    return 64 << 20


# ------------------------------- kernels --------------------------------------

def _conv_head_kernel_hw_lanes(x_ref, w_ref, shift_ref, o_ref):
    # x_ref:     (C_in, thw)   activation tile (f32/bf16), HW on lanes
    # w_ref:     (tco, C_in)   bf16 1x1-conv weight with BN scale pre-folded
    # shift_ref: (tco, 1)      f32 folded BN shift
    # o_ref:     (tco, thw)    output tile, lane-dense along HW
    x = x_ref[...].astype(jnp.bfloat16)                   # VPU cast (free at mem-bound)
    y = jnp.dot(w_ref[...], x, preferred_element_type=jnp.float32)
    y = y + shift_ref[...]                                # folded BatchNorm (f32)
    sig = pl.reciprocal(1.0 + jnp.exp(-y), approx=True)   # sigmoid on the EUP slot
    o_ref[...] = (y * sig).astype(o_ref.dtype)            # SiLU, cast on final store


def _conv_head_kernel_cout_lanes(x_ref, wt_ref, shift_ref, o_ref):
    # Small-HW (HW < 128) layout: compute (HW, C_out) so C_out is the lane axis.
    # x_ref:     (C_in, HW)    activation of one image
    # wt_ref:    (C_in, C_out) bf16 weight (transposed), BN scale pre-folded
    # shift_ref: (1, C_out)    f32 folded BN shift
    # o_ref:     (HW, C_out)   lane-dense along C_out
    x = x_ref[...].astype(jnp.bfloat16)
    y = jax.lax.dot_general(
        x, wt_ref[...],
        dimension_numbers=(((0,), (0,)), ((), ())),       # contract over C_in
        preferred_element_type=jnp.float32)
    y = y + shift_ref[...]
    sig = pl.reciprocal(1.0 + jnp.exp(-y), approx=True)
    o_ref[...] = (y * sig).astype(o_ref.dtype)


# ------------------------------- wrappers --------------------------------------

def _forward_hw_lanes(x, w_folded, shift, N, C_in, C_out, HW,
                      out_dtype, x_b, out_b, vmem_cap, max_thw):
    # C_out tile: keep all of C_out resident so X is read from HBM exactly once.
    if C_out <= 2048:
        tco = C_out
    else:
        tco = _round_down(2048, 256)          # 256-aligned for the 2x256^2 MXU
    n_co = pl.cdiv(C_out, tco)

    # HW tile sized from the VMEM budget: x and out double-buffered, w/shift
    # counted double-buffered for safety (they may be single-buffered below).
    budget = int(vmem_cap * 0.70)
    fixed = 2 * (tco * C_in * 2 + tco * 128 * 4)     # w (bf16) + shift (f32, lane-padded)
    per_thw = 2 * C_in * x_b + 2 * tco * out_b
    thw = max(128, (budget - fixed) // per_thw)
    thw = min(thw, max_thw)
    if thw >= HW:
        thw = HW
    else:
        thw = _round_down(thw, 128)

    # Megacore guard: keep >= 2 parallel grid steps when N == 1 (v7x has 2 TCs).
    if N == 1 and n_co == 1 and thw >= HW and HW >= 256:
        thw = _round_down(-(-HW // 2), 128)
    n_hw = pl.cdiv(HW, thw)

    shift2d = shift.reshape(C_out, 1)

    working = (2 * C_in * thw * x_b + 2 * tco * thw * out_b
               + 2 * tco * C_in * 2 + 2 * tco * 128 * 4)
    vmem_limit = int(min(working + (16 << 20), vmem_cap - (2 << 20)))

    x_spec = pl.BlockSpec((None, C_in, thw), lambda n, k, j: (n, 0, k))
    out_spec = pl.BlockSpec((None, tco, thw), lambda n, k, j: (n, j, k))

    def call(in_specs):
        return pl.pallas_call(
            _conv_head_kernel_hw_lanes,
            out_shape=jax.ShapeDtypeStruct((N, C_out, HW), out_dtype),
            grid_spec=pltpu.PrefetchScalarGridSpec(
                num_scalar_prefetch=0,
                grid=(N, n_hw, n_co),          # C_out axis innermost: x stays resident
                in_specs=in_specs,
                out_specs=out_spec,
            ),
            compiler_params=pltpu.CompilerParams(
                dimension_semantics=("parallel", "parallel", "parallel"),
                vmem_limit_bytes=vmem_limit,
            ),
        )(x, w_folded, shift2d)

    try:
        # w/shift have a constant block index along the inner axes and are tiny:
        # single-buffer them to reclaim VMEM (matters on v7x's 64 MiB per core).
        in_specs = [
            x_spec,
            pl.BlockSpec((tco, C_in), lambda n, k, j: (j, 0),
                         pipeline_mode=pl.Buffered(1)),
            pl.BlockSpec((tco, 1), lambda n, k, j: (j, 0),
                         pipeline_mode=pl.Buffered(1)),
        ]
        return call(in_specs)
    except Exception:
        # Fallback if this JAX version rejects pipeline_mode on pallas_call specs.
        in_specs = [
            x_spec,
            pl.BlockSpec((tco, C_in), lambda n, k, j: (j, 0)),
            pl.BlockSpec((tco, 1), lambda n, k, j: (j, 0)),
        ]
        return call(in_specs)


def _forward_cout_lanes(x, w_folded, shift, N, C_in, C_out, HW,
                        out_dtype, x_b, out_b, vmem_cap):
    wt = jnp.transpose(w_folded, (1, 0))       # (C_in, C_out): tiny, done once
    shift2d = shift.reshape(1, C_out)

    working = (2 * C_in * HW * x_b + 2 * HW * C_out * out_b
               + 2 * C_in * C_out * 2 + 2 * 8 * C_out * 4)
    vmem_limit = int(min(working + (16 << 20), vmem_cap - (2 << 20)))

    return pl.pallas_call(
        _conv_head_kernel_cout_lanes,
        out_shape=jax.ShapeDtypeStruct((N, HW, C_out), out_dtype),
        grid_spec=pltpu.PrefetchScalarGridSpec(
            num_scalar_prefetch=0,
            grid=(N,),
            in_specs=[
                pl.BlockSpec((None, C_in, HW), lambda n: (n, 0, 0)),
                pl.BlockSpec((C_in, C_out), lambda n: (0, 0)),
                pl.BlockSpec((1, C_out), lambda n: (0, 0)),
            ],
            out_specs=pl.BlockSpec((None, HW, C_out), lambda n: (n, 0, 0)),
        ),
        compiler_params=pltpu.CompilerParams(
            dimension_semantics=("parallel",),
            vmem_limit_bytes=vmem_limit,
        ),
    )(x, wt, shift2d)


def conv_head_forward(x_nchw, w_oi, gamma, beta, running_mean, running_var,
                      eps=1e-5, out_dtype=jnp.bfloat16, max_thw=4096):
    """1x1 conv (no bias) + inference BatchNorm + SiLU. NCHW in / NCHW out.

    x_nchw: (N, C_in, H, W); w_oi: (C_out, C_in) from the 1x1 conv_head weight.
    BN is folded: scale goes into the (bf16) weight, shift stays f32. Output
    defaults to bfloat16 (feeds global pooling); pass out_dtype=jnp.float32 to
    keep the module's f32 output dtype.
    """
    N, C_in, H, W = x_nchw.shape
    C_out = w_oi.shape[0]
    HW = H * W

    scale = gamma.astype(jnp.float32) / jnp.sqrt(
        running_var.astype(jnp.float32) + eps)
    shift = beta.astype(jnp.float32) - running_mean.astype(jnp.float32) * scale
    w_folded = (w_oi.astype(jnp.float32) * scale[:, None]).astype(jnp.bfloat16)

    # NCHW consumed natively: (N, C_in, H, W) -> (N, C_in, H*W). Reshape only, no
    # transpose, and no standalone bf16 pre-cast of x (cast happens in the kernel).
    x = x_nchw.reshape(N, C_in, HW)
    x_b = np.dtype(x.dtype).itemsize
    out_b = np.dtype(out_dtype).itemsize
    vmem_cap = _vmem_capacity_bytes()

    if HW >= 128:
        out = _forward_hw_lanes(x, w_folded, shift, N, C_in, C_out, HW,
                                out_dtype, x_b, out_b, vmem_cap, max_thw)
        return out.reshape(N, C_out, H, W)

    # Small-HW regime (e.g. 7x7=49): transposed product keeps stores lane-dense.
    out = _forward_cout_lanes(x, w_folded, shift, N, C_in, C_out, HW,
                              out_dtype, x_b, out_b, vmem_cap)
    # (N, HW, C_out) -> (N, C_out, H, W): tiny tensor in this regime.
    return jnp.transpose(out, (0, 2, 1)).reshape(N, C_out, H, W)


# ------------------------------- test harness ----------------------------------

def _reference(x, w, gamma, beta, mean, var, eps=1e-5):
    # Mirrors the kernel's numerics: BN scale folded into a bf16 weight, x rounded
    # to bf16, f32 accumulation/epilogue, exact sigmoid.
    scale = gamma / jnp.sqrt(var + eps)
    shift = beta - mean * scale
    w_f = (w * scale[:, None]).astype(jnp.bfloat16).astype(jnp.float32)
    x_f = x.astype(jnp.bfloat16).astype(jnp.float32)
    y = jnp.einsum('oc,nchw->nohw', w_f, x_f)
    y = y + shift[None, :, None, None]
    return y * jax.nn.sigmoid(y)


if __name__ == "__main__":
    key = jax.random.PRNGKey(0)
    k_x, k_w, k_g, k_b, k_m, k_v, k_x2 = jax.random.split(key, 7)

    # Small shapes consistent with the module (1x1 conv_head on an NCHW feature map).
    N, C_in, C_out = 2, 4, 32
    w = jax.random.normal(k_w, (C_out, C_in), jnp.float32) / jnp.sqrt(C_in)
    gamma = 1.0 + 0.1 * jax.random.normal(k_g, (C_out,), jnp.float32)
    beta = 0.1 * jax.random.normal(k_b, (C_out,), jnp.float32)
    mean = 0.1 * jax.random.normal(k_m, (C_out,), jnp.float32)
    var = jnp.abs(jax.random.normal(k_v, (C_out,), jnp.float32)) + 0.5

    # Case 1: main path (HW >= 128), H = W = 16.
    x1 = jax.random.normal(k_x, (N, C_in, 16, 16), jnp.float32)
    out1 = jax.block_until_ready(conv_head_forward(x1, w, gamma, beta, mean, var))
    ref1 = _reference(x1, w, gamma, beta, mean, var)
    err1 = float(jnp.max(jnp.abs(out1.astype(jnp.float32) - ref1)))
    assert out1.shape == (N, C_out, 16, 16), out1.shape
    assert jnp.allclose(out1.astype(jnp.float32), ref1, atol=3e-2, rtol=3e-2), err1

    # Case 2: small-HW fast path (HW < 128), H = W = 7.
    x2 = jax.random.normal(k_x2, (N, C_in, 7, 7), jnp.float32)
    out2 = jax.block_until_ready(conv_head_forward(x2, w, gamma, beta, mean, var))
    ref2 = _reference(x2, w, gamma, beta, mean, var)
    err2 = float(jnp.max(jnp.abs(out2.astype(jnp.float32) - ref2)))
    assert out2.shape == (N, C_out, 7, 7), out2.shape
    assert jnp.allclose(out2.astype(jnp.float32), ref2, atol=3e-2, rtol=3e-2), err2

    print("KERNEL_OK")
</pallas_src>

<mosaic_0001>
module attributes {stable_mosaic.version = 11 : i64} {
  func.func @_conv_head_kernel_hw_lanes(%arg0: i32, %arg1: i32, %arg2: i32, %arg3: memref<1x4x256xf32, #tpu.memory_space<vmem>>, %arg4: memref<32x4xbf16, #tpu.memory_space<vmem>>, %arg5: memref<32x1xf32, #tpu.memory_space<vmem>>, %arg6: memref<1x32x256xbf16, #tpu.memory_space<vmem>>) attributes {dimension_semantics = [#tpu.dimension_semantics<parallel>, #tpu.dimension_semantics<parallel>, #tpu.dimension_semantics<parallel>], iteration_bounds = array<i64: 2, 1, 1>, scalar_prefetch = 0 : i64, scratch_operands = 0 : i64, tpu.core_type = #tpu.core_type<tc>, window_params = [{transform_indices = @transform_0, window_bounds = array<i64: 1, 4, 256>}, {pipeline_mode = #tpu.pipeline_mode<synchronous>, transform_indices = @transform_1, window_bounds = array<i64: 32, 4>}, {pipeline_mode = #tpu.pipeline_mode<synchronous>, transform_indices = @transform_2, window_bounds = array<i64: 32, 1>}, {transform_indices = @transform_3, window_bounds = array<i64: 1, 32, 256>}]} {
    %c0 = arith.constant 0 : index
    %c0_0 = arith.constant 0 : index
    %c0_1 = arith.constant 0 : index
    %0 = vector.load %arg3[%c0, %c0_0, %c0_1] : memref<1x4x256xf32, #tpu.memory_space<vmem>>, vector<1x4x256xf32>
    %1 = vector.shape_cast %0 : vector<1x4x256xf32> to vector<4x256xf32>
    %2 = arith.truncf %1 : vector<4x256xf32> to vector<4x256xbf16>
    %c0_2 = arith.constant 0 : index
    %c0_3 = arith.constant 0 : index
    %3 = vector.load %arg4[%c0_2, %c0_3] : memref<32x4xbf16, #tpu.memory_space<vmem>>, vector<32x4xbf16>
    %cst = arith.constant dense<0.000000e+00> : vector<32x256xf32>
    %4 = tpu.matmul %3, %2, %cst {dimension_numbers = #tpu.dot_dimension_numbers<[1], [0], [0], [1], [0, 0, 1, 1], [], []>} : vector<32x4xbf16>, vector<4x256xbf16>, vector<32x256xf32> -> vector<32x256xf32>
    %c0_4 = arith.constant 0 : index
    %c0_5 = arith.constant 0 : index
    %5 = vector.load %arg5[%c0_4, %c0_5] : memref<32x1xf32, #tpu.memory_space<vmem>>, vector<32x1xf32>
    %6 = vector.broadcast %5 : vector<32x1xf32> to vector<32x256xf32>
    %7 = arith.addf %4, %6 : vector<32x256xf32>
    %cst_6 = arith.constant 0.000000e+00 : f32
    %8 = vector.broadcast %cst_6 : f32 to vector<32x256xf32>
    %9 = arith.subf %8, %7 : vector<32x256xf32>
    %10 = math.exp %9 : vector<32x256xf32>
    %cst_7 = arith.constant 1.000000e+00 : f32
    %11 = vector.broadcast %cst_7 : f32 to vector<32x256xf32>
    %12 = arith.addf %11, %10 : vector<32x256xf32>
    %13 = tpu.reciprocal %12 {approx = true} : vector<32x256xf32> -> vector<32x256xf32>
    %14 = arith.mulf %7, %13 : vector<32x256xf32>
    %15 = arith.truncf %14 : vector<32x256xf32> to vector<32x256xbf16>
    %c0_8 = arith.constant 0 : index
    %c0_9 = arith.constant 0 : index
    %c0_10 = arith.constant 0 : index
    %16 = vector.load %arg6[%c0_8, %c0_9, %c0_10] : memref<1x32x256xbf16, #tpu.memory_space<vmem>>, vector<1x32x256xbf16>
    %17 = vector.shape_cast %16 : vector<1x32x256xbf16> to vector<32x256xbf16>
    %18 = vector.shape_cast %15 : vector<32x256xbf16> to vector<1x32x256xbf16>
    tpu.vector_store %arg6[%c0_8, %c0_9, %c0_10], %18 {strides = array<i32>} : memref<1x32x256xbf16, #tpu.memory_space<vmem>>, vector<1x32x256xbf16>,
    return
  }
  func.func @transform_0(%arg0: i32, %arg1: i32, %arg2: i32) -> (i32, i32, i32) {
    %c0_i32 = arith.constant 0 : i32
    %c0_i32_0 = arith.constant 0 : i32
    return %arg0, %c0_i32, %arg1 : i32, i32, i32
  }
  func.func @transform_1(%arg0: i32, %arg1: i32, %arg2: i32) -> (i32, i32) {
    %c0_i32 = arith.constant 0 : i32
    %c0_i32_0 = arith.constant 0 : i32
    return %arg2, %c0_i32 : i32, i32
  }
  func.func @transform_2(%arg0: i32, %arg1: i32, %arg2: i32) -> (i32, i32) {
    %c0_i32 = arith.constant 0 : i32
    %c0_i32_0 = arith.constant 0 : i32
    return %arg2, %c0_i32 : i32, i32
  }
  func.func @transform_3(%arg0: i32, %arg1: i32, %arg2: i32) -> (i32, i32, i32) {
    %c0_i32 = arith.constant 0 : i32
    return %arg0, %arg2, %arg1 : i32, i32, i32
  }
}

module attributes {stable_mosaic.version = 11 : i64} {
  func.func @_conv_head_kernel_hw_lanes(%arg0: i32, %arg1: i32, %arg2: i32, %arg3: memref<1x4x256xf32, #tpu.memory_space<vmem>>, %arg4: memref<32x4xbf16, #tpu.memory_space<vmem>>, %arg5: memref<32x1xf32, #tpu.memory_space<vmem>>, %arg6: memref<1x32x256xbf16, #tpu.memory_space<vmem>>) attributes {dimension_semantics = [#tpu.dimension_semantics<parallel>, #tpu.dimension_semantics<parallel>, #tpu.dimension_semantics<parallel>], iteration_bounds = array<i64: 2, 1, 1>, scalar_prefetch = 0 : i64, scratch_operands = 0 : i64, tpu.core_type = #tpu.core_type<tc>, window_params = [{transform_indices = @transform_0, window_bounds = array<i64: 1, 4, 256>}, {transform_indices = @transform_1, window_bounds = array<i64: 32, 4>}, {transform_indices = @transform_2, window_bounds = array<i64: 32, 1>}, {transform_indices = @transform_3, window_bounds = array<i64: 1, 32, 256>}]} {
    %c0 = arith.constant 0 : index
    %c0_0 = arith.constant 0 : index
    %c0_1 = arith.constant 0 : index
    %0 = vector.load %arg3[%c0, %c0_0, %c0_1] : memref<1x4x256xf32, #tpu.memory_space<vmem>>, vector<1x4x256xf32>
    %1 = vector.shape_cast %0 : vector<1x4x256xf32> to vector<4x256xf32>
    %2 = arith.truncf %1 : vector<4x256xf32> to vector<4x256xbf16>
    %c0_2 = arith.constant 0 : index
    %c0_3 = arith.constant 0 : index
    %3 = vector.load %arg4[%c0_2, %c0_3] : memref<32x4xbf16, #tpu.memory_space<vmem>>, vector<32x4xbf16>
    %cst = arith.constant dense<0.000000e+00> : vector<32x256xf32>
    %4 = tpu.matmul %3, %2, %cst {dimension_numbers = #tpu.dot_dimension_numbers<[1], [0], [0], [1], [0, 0, 1, 1], [], []>} : vector<32x4xbf16>, vector<4x256xbf16>, vector<32x256xf32> -> vector<32x256xf32>
    %c0_4 = arith.constant 0 : index
    %c0_5 = arith.constant 0 : index
    %5 = vector.load %arg5[%c0_4, %c0_5] : memref<32x1xf32, #tpu.memory_space<vmem>>, vector<32x1xf32>
    %6 = vector.broadcast %5 : vector<32x1xf32> to vector<32x256xf32>
    %7 = arith.addf %4, %6 : vector<32x256xf32>
    %cst_6 = arith.constant 0.000000e+00 : f32
    %8 = vector.broadcast %cst_6 : f32 to vector<32x256xf32>
    %9 = arith.subf %8, %7 : vector<32x256xf32>
    %10 = math.exp %9 : vector<32x256xf32>
    %cst_7 = arith.constant 1.000000e+00 : f32
    %11 = vector.broadcast %cst_7 : f32 to vector<32x256xf32>
    %12 = arith.addf %11, %10 : vector<32x256xf32>
    %13 = tpu.reciprocal %12 {approx = true} : vector<32x256xf32> -> vector<32x256xf32>
    %14 = arith.mulf %7, %13 : vector<32x256xf32>
    %15 = arith.truncf %14 : vector<32x256xf32> to vector<32x256xbf16>
    %c0_8 = arith.constant 0 : index
    %c0_9 = arith.constant 0 : index
    %c0_10 = arith.constant 0 : index
    %16 = vector.load %arg6[%c0_8, %c0_9, %c0_10] : memref<1x32x256xbf16, #tpu.memory_space<vmem>>, vector<1x32x256xbf16>
    %17 = vector.shape_cast %16 : vector<1x32x256xbf16> to vector<32x256xbf16>
    %18 = vector.shape_cast %15 : vector<32x256xbf16> to vector<1x32x256xbf16>
    tpu.vector_store %arg6[%c0_8, %c0_9, %c0_10], %18 {strides = array<i32>} : memref<1x32x256xbf16, #tpu.memory_space<vmem>>, vector<1x32x256xbf16>,
    return
  }
  func.func @transform_0(%arg0: i32, %arg1: i32, %arg2: i32) -> (i32, i32, i32) {
    %c0_i32 = arith.constant 0 : i32
    %c0_i32_0 = arith.constant 0 : i32
    return %arg0, %c0_i32, %arg1 : i32, i32, i32
  }
  func.func @transform_1(%arg0: i32, %arg1: i32, %arg2: i32) -> (i32, i32) {
    %c0_i32 = arith.constant 0 : i32
    %c0_i32_0 = arith.constant 0 : i32
    return %arg2, %c0_i32 : i32, i32
  }
  func.func @transform_2(%arg0: i32, %arg1: i32, %arg2: i32) -> (i32, i32) {
    %c0_i32 = arith.constant 0 : i32
    %c0_i32_0 = arith.constant 0 : i32
    return %arg2, %c0_i32 : i32, i32
  }
  func.func @transform_3(%arg0: i32, %arg1: i32, %arg2: i32) -> (i32, i32, i32) {
    %c0_i32 = arith.constant 0 : i32
    return %arg0, %arg2, %arg1 : i32, i32, i32
  }
}

</mosaic_0001>

<bundles_post_ra>
// kernel: tpu_custom_call.1
= control target key start
LH: loop header
LB: loop body
LE: loop exit
PB: predicated region body
PF: predicated region fallthrough
CT: control target
= control target key end

     0   :  { %8 = vsyncpa [#allocation3], 0  ;;  %s968_s0 = inlined_call_operand.vmem [shape: f32[2,4,256], index: 0, kind: input, shape index: {}]   ;;  %s969_s1 = inlined_call_operand.vmem [shape: bf16[32,4], index: 1, kind: input, shape index: {}]   ;;  %s970_s2 = inlined_call_operand.vmem [shape: f32[32,1], index: 2, kind: input, shape index: {}]   ;;  %s971_s3 = inlined_call_operand.hbm [shape: bf16[2,32,256], index: 3, kind: output, shape index: {}]  }
   0x1   :  { %10 = vsyncpa [#allocation3 + $0x1], 0  ;;  %s804_s12 = smov 0   ;;  %s806_s13 = smov 0  }
   0x2   :  { %s808_s14 = smov 0   ;;  %s810_s15 = smov 0  }
   0x3   :  { %s812_s16 = smov 0   ;;  %s814_s17 = smov 0  }
   0x4 LB: > { %s575_s18 = sadd.s32 4294967295, %s778_s17   ;;  %s576_s19 = sadd.s32 4294967294, %s778_s17   ;;  %s778_s17 = sphi %s814_s17, %s16_s17   ;;  %s774_s16 = sphi %s812_s16, %s978_s16   ;;  %s770_s15 = sphi %s810_s15, %s977_s15   ;;  %s766_s14 = sphi %s808_s14, %s976_s14   ;;  %s762_s13 = sphi %s806_s13, %s975_s13   ;;  %s758_s12 = sphi %s804_s12, %s974_s12  }
   0x5   : > { %s35_s20 = sadd.s32 1, %s774_s16  ;;  %s126_s21 = sadd.s32 1, %s766_s14 }
   0x6   : > { %p37_p0 = scmp.ge.s32.totalorder %s35_s20, 2  ;;  %p136_p1 = scmp.ne.s32.totalorder %s766_s14, %s762_s13 }
   0x7   : > { %p137_p2 = scmp.eq.s32.totalorder %s575_s18, 1  ;;  %p142_p3 = scmp.ne.s32.totalorder %s762_s13, %s758_s12 }
   0x8   : > { %s980_s20 = smov (%p37_p0, %s35_s20), 0  ;;  %p143_p5 = scmp.eq.s32.totalorder %s576_s19, 1 }
   0x9   : > { %p844_p4 = por %p137_p2, %p136_p1  ;;  %s119_s23 = ssub.s32 %s774_s16, %s980_s20 }
   0xa   : > { %p581_p6 = scmp.ge.s32.totalorder %s778_s17, 1  ;;  %p124_p7 = scmp.eq.s32.totalorder %s119_s23, 0 }
   0xb   : > { %p851_p8 = por %p143_p5, %p142_p3  ;;  %p192_p9 = scmp.lt.s32.totalorder %s778_s17, 3 }
   0xc   : > { %s857_s25 = scalar_select %p124_p7, %s766_s14, %s126_s21  }
   0xd   : > { %p193_p10 = pnand %p581_p6, %p192_p9 }
   0xe   : > { %p231_p11 = scmp.lt.s32.totalorder (!%p193_p10), %s770_s15, 1  ;;  %s604_s30 = sshll.u32 (!%p193_p10), %s770_s15, 9 }
   0xf   : > { %196 = sbr.rel (%p193_p10) target bundleno = 288 (0x120), region = 32  ;;  %s781_s8 = smov (!%p193_p10), [#allocation2]  }
  0x10   : > { %s706_s9 = sshll.u32 (!%p193_p10), %s781_s8, 4  ;;  %s707_s9 = int_to_ptr.vmem [resolvable:$false] %s706_s9 }
  0x11   : > { %s708_s10 = scalar_lea.vmem (!%p193_p10), %s707_s9, 1024 }
  0x14   : > { %v780_v0 = vmov 0   ;;  %s232_s26 = scalar_select %p231_p11, %s770_s15, 1  ;;  %v267_v1 = vld [vmem:[%s970_s2 + $0x10] sm:$0xff]  ;;  %v265_v2 = vld [vmem:[%s970_s2] sm:$0xff]  ;;  %v268_v3 = vld [vmem:[%s970_s2 + $0x18] sm:$0xff]  ;;  %vm306_vm0 = vcmask 1041408  }
  0x15   : > { %345 = vmatprep.mubr.bf16.mxu0 %v780_v0  ;;  %355 = vmatprep.mubr.bf16.mxu1 %v780_v0  ;;  %v266_v4 = vld [vmem:[%s970_s2 + $0x8] sm:$0xff]  ;;  %v668_v10 = vld [vmem:[%s969_s1] sm:$0xff]   ;;  %vm299_vm1 = vcmask 31744   ;;  %s919_s15 = scalar_lea.hbm %s971_s3, %s604_s30 }
  0x16   : > { %666 = vset.pattern.permute.xlu1 %v780_v0  ;;  %665 = vset.pattern.permute.xlu0 %v780_v0  ;;  %s599_s4 = sshll.u32 %s232_s26, 3  ;;  %v669_v11 = vld [vmem:[%s969_s1 + $0x8] sm:$0xff]   ;;  %s227_s26 = sand.u32 1, %s762_s13  }
  0x17   : > { %281 = vperm.xlu1 %666, %v267_v1   ;;  %271 = vperm.xlu0 %665, %v265_v2   ;;  %s238_s11 = scalar_lea.vmem %s968_s0, %s599_s4  ;;  %s582_s27 = sshll.u32 %s227_s26, 5 }
  0x18   : > { %v255_v5 = vld [vmem:[%s238_s11] sm:$0xff]  ;;  %s229_s28 = scalar_lea.vmem [#allocation2], %s582_s27  ;;  %s923_s6 = scalar_lea.sflag [#allocation3], %s227_s26 }
  0x19   : > { %v257_v6 = vcombine.high %v255_v5, %v255_v5  ;;  %v259_v7 = vpack.c.bf16 %v255_v5, %v255_v5  ;;  %s461_s29 = sshll.u32 %s229_s28, 4  ;;  %s914_s29 = int_to_ptr.vmem [resolvable:$true] %s461_s29 }
  0x1a   : > { %s702_s7 = scalar_lea.vmem %s914_s29, 512  ;;  %p709_p1 = scmp.lt.s32.totalorder %s914_s29, %s707_s9 }
  0x1b   : > { %286 = vperm.xlu1 %666, %v268_v3   ;;  %276 = vperm.xlu0 %665, %v266_v4   ;;  %v260_v8 = vpack.c.bf16 %v257_v6, %v257_v6  ;;  %v308_v9 = vsel %vm306_vm0, %v259_v7, 0  ;;  %p703_p12 = scmp.ne.s32.totalorder %s914_s29, %s702_s7  ;;  %p710_p2 = scmp.lt.s32.totalorder %s708_s10, %s702_s7 }
  0x1d   : > { %587 = vmatprep.subr.msk.bf16.mxu0 %vm306_vm0, %v260_v8  ;;  %605 = vmatprep.subr.msk.bf16.mxu1 %vm306_vm0, %v260_v8  ;;  %p704_p13 = pnand %p703_p12, %p844_p4  ;;  %p711_p3 = por %p710_p2, %p709_p1 }
  0x1e   : > { %328 = vmatpush1.bf16.msra.mxu0 %v308_v9  ;;  %606 = vmatpush1.bf16.msra.mxu1 %v308_v9 }
  0x1f   : > { %p705_p0 = pneg %p704_p13 }
  0x21   : > { %588 = vmatmul.mubr.msk.bf16.vlgmr.msra.gmra.mxu0 %vm299_vm1, %v668_v10  ;;  %589 = vmatmul.mubr.msk.bf16.vlgmr.msra.gmra.mxu1 %vm299_vm1, %v669_v11  ;;  %p712_p5 = pnand %p711_p3, %p705_p0 }
  0x92   : > { %v282_v12 = vpop.permute.xlu1 %281  ;;  %v272_v13 = vpop.permute.xlu0 %271 }
  0x96   : > { %v287_v28 = vpop.permute.xlu1 %286  ;;  %v277_v29 = vpop.permute.xlu0 %276 }
  0xe1   : > { %v347_v14 = vpop.f32.mrf.mxu0  ;;  %v357_v15 = vpop.f32.mrf.mxu1 }
  0xe2   : > { %v882_v16 = vadd.f32 %v347_v14, %v272_v13  ;;  %v884_v17 = vadd.f32 %v357_v15, %v282_v12 }
  0xe3   : > { %v349_v18 = vpop.f32.mrf.mxu0  ;;  %v359_v19 = vpop.f32.mrf.mxu1 }
  0xe4   : > { %v366_v20 = vsub.f32 0.0, %v882_v16  ;;  %v370_v21 = vsub.f32 0.0, %v884_v17  ;;  %v888_v22 = vadd.f32 %v349_v18, %v272_v13  ;;  %v890_v23 = vadd.f32 %v359_v19, %v282_v12 }
  0xe5   : > { %v351_v24 = vpop.f32.mrf.mxu0  ;;  %v361_v25 = vpop.f32.mrf.mxu1 }
  0xe6   : > { %v374_v26 = vmul.f32 1.442695, %v366_v20  ;;  %v382_v27 = vmul.f32 1.442695, %v370_v21  ;;  %v367_v30 = vsub.f32 0.0, %v888_v22  ;;  %v371_v31 = vsub.f32 0.0, %v890_v23 }
  0xe7   : > { %v894_v32 = vadd.f32 %v351_v24, %v277_v29  ;;  %v896_v33 = vadd.f32 %v361_v25, %v287_v28  ;;  %v353_v34 = vpop.f32.mrf.mxu0  ;;  %v363_v35 = vpop.f32.mrf.mxu1 }
  0xe8   : > { %670 = vpow2.f32 %v374_v26  ;;  %v376_v36 = vmul.f32 1.442695, %v367_v30  ;;  %v384_v37 = vmul.f32 1.442695, %v371_v31  ;;  %v898_v38 = vadd.f32 %v353_v34, %v277_v29 }
  0xe9   : > { %672 = vpow2.f32 %v382_v27  ;;  %v368_v39 = vsub.f32 0.0, %v894_v32  ;;  %v372_v40 = vsub.f32 0.0, %v896_v33  ;;  %v364_v41 = vadd.f32 %v363_v35, %v287_v28 }
  0xea   : > { %674 = vpow2.f32 %v376_v36  ;;  %v369_v42 = vsub.f32 0.0, %v898_v38 }
  0xeb   : > { %676 = vpow2.f32 %v384_v37  ;;  %v378_v43 = vmul.f32 1.442695, %v368_v39  ;;  %v386_v44 = vmul.f32 1.442695, %v372_v40  ;;  %v373_v45 = vsub.f32 0.0, %v364_v41 }
  0xec   : > { %v380_v46 = vmul.f32 1.442695, %v369_v42 }
  0xed   : > { %678 = vpow2.f32 %v378_v43  ;;  %v388_v47 = vmul.f32 1.442695, %v373_v45 }
  0xee   : > { %680 = vpow2.f32 %v386_v44 }
  0xef   : > { %682 = vpow2.f32 %v380_v46 }
  0xf0   : > { %684 = vpow2.f32 %v388_v47 }
  0xf5   : > { %v671_v48 = vpop.eup %670 }
  0xf6   : > { %v673_v49 = vpop.eup %672  ;;  %v390_v50 = vadd.f32 1.0, %v671_v48 }
  0xf7   : > { %v675_v51 = vpop.eup %674  ;;  %v394_v52 = vadd.f32 1.0, %v673_v49 }
  0xf8   : > { %v677_v53 = vpop.eup %676  ;;  %686 = vrcp.f32 %v390_v50  ;;  %v391_v54 = vadd.f32 1.0, %v675_v51 }
  0xf9   : > { %688 = vrcp.f32 %v394_v52  ;;  %v395_v55 = vadd.f32 1.0, %v677_v53 }
  0xfa   : > { %v679_v56 = vpop.eup %678  ;;  %690 = vrcp.f32 %v391_v54 }
  0xfb   : > { %v681_v57 = vpop.eup %680  ;;  %692 = vrcp.f32 %v395_v55  ;;  %v392_v58 = vadd.f32 1.0, %v679_v56 }
  0xfc   : > { %v683_v59 = vpop.eup %682  ;;  %v396_v60 = vadd.f32 1.0, %v681_v57 }
  0xfd   : > { %v685_v61 = vpop.eup %684  ;;  %694 = vrcp.f32 %v392_v58  ;;  %v393_v62 = vadd.f32 1.0, %v683_v59 }
  0xfe   : > { %696 = vrcp.f32 %v396_v60  ;;  %v397_v63 = vadd.f32 1.0, %v685_v61 }
  0xff   : > { %698 = vrcp.f32 %v393_v62 }
 0x100   : > { %700 = vrcp.f32 %v397_v63 }
 0x105   : > { %v687_v0 = vpop.eup %686 }
 0x106   : > { %v689_v1 = vpop.eup %688  ;;  %v406_v4 = vmul.f32 %v687_v0, %v882_v16 }
 0x107   : > { %v691_v2 = vpop.eup %690  ;;  %v410_v6 = vmul.f32 %v689_v1, %v884_v17 }
 0x108   : > { %v693_v3 = vpop.eup %692  ;;  %v407_v5 = vmul.f32 %v691_v2, %v888_v22 }
 0x109   : > { %v411_v7 = vmul.f32 %v693_v3, %v890_v23 }
 0x10a   : > { %v695_v8 = vpop.eup %694  ;;  %v600_v9 = vpack.c.bf16 %v407_v5, %v406_v4 }
 0x10b   : > { %v697_v10 = vpop.eup %696  ;;  %v602_v11 = vpack.c.bf16 %v411_v7, %v410_v6  ;;  %v408_v14 = vmul.f32 %v695_v8, %v894_v32 }
 0x10c   : > { %v699_v12 = vpop.eup %698  ;;  %438 = vst [vmem:[%s229_s28] sm:$0xff] %v600_v9  ;;  %v412_v16 = vmul.f32 %v697_v10, %v896_v33 }
 0x10d   : > { %v701_v13 = vpop.eup %700  ;;  %440 = vst [vmem:[%s229_s28 + $0x10] sm:$0xff] %v602_v11  ;;  %v409_v15 = vmul.f32 %v699_v12, %v898_v38 }
 0x10e   : > { %v413_v17 = vmul.f32 %v701_v13, %v364_v41 }
 0x10f   : > { %v601_v18 = vpack.c.bf16 %v409_v15, %v408_v14 }
 0x110   : > { %v603_v19 = vpack.c.bf16 %v413_v17, %v412_v16 }
 0x111   : > { %439 = vst [vmem:[%s229_s28 + $0x8] sm:$0xff] %v601_v18 }
 0x112   : > { %441 = vst [vmem:[%s229_s28 + $0x18] sm:$0xff] %v603_v19 }
 0x113   : > { %715 = shalt.err (!%p712_p5)
}
 0x114   : > { %s716_s11 = scalar_lea.hbm %s919_s15, 512  ;;  %s720_s21 = scalar_lea.hbm %s971_s3, 1024 }
 0x115   : > { %p717_p6 = scmp.ne.s32.totalorder %s919_s15, %s716_s11  ;;  %p721_p10 = scmp.lt.s32.totalorder %s919_s15, %s971_s3 }
 0x116   : > { %p722_p11 = scmp.lt.s32.totalorder %s720_s21, %s716_s11 }
 0x117   : > { %p718_p7 = pnand %p717_p6, %p844_p4 }
 0x118   : > { %p723_p12 = por %p722_p11, %p721_p10 }
 0x119   : > { %p719_p9 = pneg %p718_p7 }
 0x11b   : > { %p724_p13 = pnand %p723_p12, %p719_p9 }
 0x11d   : > { %727 = shalt.err (!%p724_p13)
}
 0x11e   : > { %s782_s27 = smov 128   ;;  %s783_s28 = smov 8  }
 0x11f   : > { %607 = dma.vmem_to_hbm [thread:$0]  (%p844_p4), %s914_s29, 512, %s919_s15, %s923_s6, %s782_s27, %s782_s27, %s783_s28  }
 0x120 PF: > { %p613_p0 = scmp.ge.s32.totalorder %s778_s17, 2  ;;  %s476_s30 = sand.u32 1, %s758_s12  }
 0x121   : > { %s477_s4 = scalar_lea.sflag [#allocation3], %s476_s30 }
 0x122   : > { %p610_p1 = pnand %p613_p0, %p851_p8 }
 0x124   : > { %p611_p2 = pneg %p610_p1 }
 0x126   : > { %753 = dma.done.wait (%p611_p2), %s477_s4, 512  }
 0x127   : > { %755 = vsyncadd (%p611_p2), %s477_s4, 4294966784  ;;  %s16_s17 = sadd.s32 1, %s778_s17   ;;  %s974_s12 = smov %s762_s13 }
 0x128   : > { %p13_p3 = scmp.ge.s32.totalorder %s16_s17, 4   ;;  %s975_s13 = smov %s766_s14 }
 0x129   : > { %s976_s14 = smov %s857_s25  ;;  %s977_s15 = smov %s774_s16 }
 0x12a   : > { %s978_s16 = smov %s980_s20  ;;  %15 = sbr.rel (!%p13_p3) target bundleno = 4 (0x4), region = 73 }
 0x12f   :  { %482 = vsyncpa [#allocation3], 1 }
 0x130   :  { %484 = vsyncpa [#allocation3 + $0x1], 1 }

// kernel: tpu_custom_call.1
= control target key start
LH: loop header
LB: loop body
LE: loop exit
PB: predicated region body
PF: predicated region fallthrough
CT: control target
= control target key end

     0   :  { %8 = vsyncpa [#allocation3], 0  ;;  %s968_s0 = inlined_call_operand.vmem [shape: f32[2,4,256], index: 0, kind: input, shape index: {}]   ;;  %s969_s1 = inlined_call_operand.vmem [shape: bf16[32,4], index: 1, kind: input, shape index: {}]   ;;  %s970_s2 = inlined_call_operand.vmem [shape: f32[32,1], index: 2, kind: input, shape index: {}]   ;;  %s971_s3 = inlined_call_operand.hbm [shape: bf16[2,32,256], index: 3, kind: output, shape index: {}]  }
   0x1   :  { %10 = vsyncpa [#allocation3 + $0x1], 0  ;;  %s804_s12 = smov 0   ;;  %s806_s13 = smov 0  }
   0x2   :  { %s808_s14 = smov 0   ;;  %s810_s15 = smov 0  }
   0x3   :  { %s812_s16 = smov 0   ;;  %s814_s17 = smov 0  }
   0x4 LB: > { %s575_s18 = sadd.s32 4294967295, %s778_s17   ;;  %s576_s19 = sadd.s32 4294967294, %s778_s17   ;;  %s778_s17 = sphi %s814_s17, %s16_s17   ;;  %s774_s16 = sphi %s812_s16, %s978_s16   ;;  %s770_s15 = sphi %s810_s15, %s977_s15   ;;  %s766_s14 = sphi %s808_s14, %s976_s14   ;;  %s762_s13 = sphi %s806_s13, %s975_s13   ;;  %s758_s12 = sphi %s804_s12, %s974_s12  }
   0x5   : > { %s35_s20 = sadd.s32 1, %s774_s16  ;;  %s126_s21 = sadd.s32 1, %s766_s14 }
   0x6   : > { %p37_p0 = scmp.ge.s32.totalorder %s35_s20, 2  ;;  %p136_p1 = scmp.ne.s32.totalorder %s766_s14, %s762_s13 }
   0x7   : > { %p137_p2 = scmp.eq.s32.totalorder %s575_s18, 1  ;;  %p142_p3 = scmp.ne.s32.totalorder %s762_s13, %s758_s12 }
   0x8   : > { %s980_s20 = smov (%p37_p0, %s35_s20), 0  ;;  %p143_p5 = scmp.eq.s32.totalorder %s576_s19, 1 }
   0x9   : > { %p844_p4 = por %p137_p2, %p136_p1  ;;  %s119_s23 = ssub.s32 %s774_s16, %s980_s20 }
   0xa   : > { %p581_p6 = scmp.ge.s32.totalorder %s778_s17, 1  ;;  %p124_p7 = scmp.eq.s32.totalorder %s119_s23, 0 }
   0xb   : > { %p851_p8 = por %p143_p5, %p142_p3  ;;  %p192_p9 = scmp.lt.s32.totalorder %s778_s17, 3 }
   0xc   : > { %s857_s25 = scalar_select %p124_p7, %s766_s14, %s126_s21  }
   0xd   : > { %p193_p10 = pnand %p581_p6, %p192_p9 }
   0xe   : > { %p231_p11 = scmp.lt.s32.totalorder (!%p193_p10), %s770_s15, 1  ;;  %s604_s30 = sshll.u32 (!%p193_p10), %s770_s15, 9 }
   0xf   : > { %196 = sbr.rel (%p193_p10) target bundleno = 288 (0x120), region = 32  ;;  %s781_s8 = smov (!%p193_p10), [#allocation2]  }
  0x10   : > { %s706_s9 = sshll.u32 (!%p193_p10), %s781_s8, 4  ;;  %s707_s9 = int_to_ptr.vmem [resolvable:$false] %s706_s9 }
  0x11   : > { %s708_s10 = scalar_lea.vmem (!%p193_p10), %s707_s9, 1024 }
  0x14   : > { %v780_v0 = vmov 0   ;;  %s232_s26 = scalar_select %p231_p11, %s770_s15, 1  ;;  %v267_v1 = vld [vmem:[%s970_s2 + $0x10] sm:$0xff]  ;;  %v265_v2 = vld [vmem:[%s970_s2] sm:$0xff]  ;;  %v268_v3 = vld [vmem:[%s970_s2 + $0x18] sm:$0xff]  ;;  %vm306_vm0 = vcmask 1041408  }
  0x15   : > { %345 = vmatprep.mubr.bf16.mxu0 %v780_v0  ;;  %355 = vmatprep.mubr.bf16.mxu1 %v780_v0  ;;  %v266_v4 = vld [vmem:[%s970_s2 + $0x8] sm:$0xff]  ;;  %v668_v10 = vld [vmem:[%s969_s1] sm:$0xff]   ;;  %vm299_vm1 = vcmask 31744   ;;  %s919_s15 = scalar_lea.hbm %s971_s3, %s604_s30 }
  0x16   : > { %666 = vset.pattern.permute.xlu1 %v780_v0  ;;  %665 = vset.pattern.permute.xlu0 %v780_v0  ;;  %s599_s4 = sshll.u32 %s232_s26, 3  ;;  %v669_v11 = vld [vmem:[%s969_s1 + $0x8] sm:$0xff]   ;;  %s227_s26 = sand.u32 1, %s762_s13  }
  0x17   : > { %281 = vperm.xlu1 %666, %v267_v1   ;;  %271 = vperm.xlu0 %665, %v265_v2   ;;  %s238_s11 = scalar_lea.vmem %s968_s0, %s599_s4  ;;  %s582_s27 = sshll.u32 %s227_s26, 5 }
  0x18   : > { %v255_v5 = vld [vmem:[%s238_s11] sm:$0xff]  ;;  %s229_s28 = scalar_lea.vmem [#allocation2], %s582_s27  ;;  %s923_s6 = scalar_lea.sflag [#allocation3], %s227_s26 }
  0x19   : > { %v257_v6 = vcombine.high %v255_v5, %v255_v5  ;;  %v259_v7 = vpack.c.bf16 %v255_v5, %v255_v5  ;;  %s461_s29 = sshll.u32 %s229_s28, 4  ;;  %s914_s29 = int_to_ptr.vmem [resolvable:$true] %s461_s29 }
  0x1a   : > { %s702_s7 = scalar_lea.vmem %s914_s29, 512  ;;  %p709_p1 = scmp.lt.s32.totalorder %s914_s29, %s707_s9 }
  0x1b   : > { %286 = vperm.xlu1 %666, %v268_v3   ;;  %276 = vperm.xlu0 %665, %v266_v4   ;;  %v260_v8 = vpack.c.bf16 %v257_v6, %v257_v6  ;;  %v308_v9 = vsel %vm306_vm0, %v259_v7, 0  ;;  %p703_p12 = scmp.ne.s32.totalorder %s914_s29, %s702_s7  ;;  %p710_p2 = scmp.lt.s32.totalorder %s708_s10, %s702_s7 }
  0x1d   : > { %587 = vmatprep.subr.msk.bf16.mxu0 %vm306_vm0, %v260_v8  ;;  %605 = vmatprep.subr.msk.bf16.mxu1 %vm306_vm0, %v260_v8  ;;  %p704_p13 = pnand %p703_p12, %p844_p4  ;;  %p711_p3 = por %p710_p2, %p709_p1 }
  0x1e   : > { %328 = vmatpush1.bf16.msra.mxu0 %v308_v9  ;;  %606 = vmatpush1.bf16.msra.mxu1 %v308_v9 }
  0x1f   : > { %p705_p0 = pneg %p704_p13 }
  0x21   : > { %588 = vmatmul.mubr.msk.bf16.vlgmr.msra.gmra.mxu0 %vm299_vm1, %v668_v10  ;;  %589 = vmatmul.mubr.msk.bf16.vlgmr.msra.gmra.mxu1 %vm299_vm1, %v669_v11  ;;  %p712_p5 = pnand %p711_p3, %p705_p0 }
  0x92   : > { %v282_v12 = vpop.permute.xlu1 %281  ;;  %v272_v13 = vpop.permute.xlu0 %271 }
  0x96   : > { %v287_v28 = vpop.permute.xlu1 %286  ;;  %v277_v29 = vpop.permute.xlu0 %276 }
  0xe1   : > { %v347_v14 = vpop.f32.mrf.mxu0  ;;  %v357_v15 = vpop.f32.mrf.mxu1 }
  0xe2   : > { %v882_v16 = vadd.f32 %v347_v14, %v272_v13  ;;  %v884_v17 = vadd.f32 %v357_v15, %v282_v12 }
  0xe3   : > { %v349_v18 = vpop.f32.mrf.mxu0  ;;  %v359_v19 = vpop.f32.mrf.mxu1 }
  0xe4   : > { %v366_v20 = vsub.f32 0.0, %v882_v16  ;;  %v370_v21 = vsub.f32 0.0, %v884_v17  ;;  %v888_v22 = vadd.f32 %v349_v18, %v272_v13  ;;  %v890_v23 = vadd.f32 %v359_v19, %v282_v12 }
  0xe5   : > { %v351_v24 = vpop.f32.mrf.mxu0  ;;  %v361_v25 = vpop.f32.mrf.mxu1 }
  0xe6   : > { %v374_v26 = vmul.f32 1.442695, %v366_v20  ;;  %v382_v27 = vmul.f32 1.442695, %v370_v21  ;;  %v367_v30 = vsub.f32 0.0, %v888_v22  ;;  %v371_v31 = vsub.f32 0.0, %v890_v23 }
  0xe7   : > { %v894_v32 = vadd.f32 %v351_v24, %v277_v29  ;;  %v896_v33 = vadd.f32 %v361_v25, %v287_v28  ;;  %v353_v34 = vpop.f32.mrf.mxu0  ;;  %v363_v35 = vpop.f32.mrf.mxu1 }
  0xe8   : > { %670 = vpow2.f32 %v374_v26  ;;  %v376_v36 = vmul.f32 1.442695, %v367_v30  ;;  %v384_v37 = vmul.f32 1.442695, %v371_v31  ;;  %v898_v38 = vadd.f32 %v353_v34, %v277_v29 }
  0xe9   : > { %672 = vpow2.f32 %v382_v27  ;;  %v368_v39 = vsub.f32 0.0, %v894_v32  ;;  %v372_v40 = vsub.f32 0.0, %v896_v33  ;;  %v364_v41 = vadd.f32 %v363_v35, %v287_v28 }
  0xea   : > { %674 = vpow2.f32 %v376_v36  ;;  %v369_v42 = vsub.f32 0.0, %v898_v38 }
  0xeb   : > { %676 = vpow2.f32 %v384_v37  ;;  %v378_v43 = vmul.f32 1.442695, %v368_v39  ;;  %v386_v44 = vmul.f32 1.442695, %v372_v40  ;;  %v373_v45 = vsub.f32 0.0, %v364_v41 }
  0xec   : > { %v380_v46 = vmul.f32 1.442695, %v369_v42 }
  0xed   : > { %678 = vpow2.f32 %v378_v43  ;;  %v388_v47 = vmul.f32 1.442695, %v373_v45 }
  0xee   : > { %680 = vpow2.f32 %v386_v44 }
  0xef   : > { %682 = vpow2.f32 %v380_v46 }
  0xf0   : > { %684 = vpow2.f32 %v388_v47 }
  0xf5   : > { %v671_v48 = vpop.eup %670 }
  0xf6   : > { %v673_v49 = vpop.eup %672  ;;  %v390_v50 = vadd.f32 1.0, %v671_v48 }
  0xf7   : > { %v675_v51 = vpop.eup %674  ;;  %v394_v52 = vadd.f32 1.0, %v673_v49 }
  0xf8   : > { %v677_v53 = vpop.eup %676  ;;  %686 = vrcp.f32 %v390_v50  ;;  %v391_v54 = vadd.f32 1.0, %v675_v51 }
  0xf9   : > { %688 = vrcp.f32 %v394_v52  ;;  %v395_v55 = vadd.f32 1.0, %v677_v53 }
  0xfa   : > { %v679_v56 = vpop.eup %678  ;;  %690 = vrcp.f32 %v391_v54 }
  0xfb   : > { %v681_v57 = vpop.eup %680  ;;  %692 = vrcp.f32 %v395_v55  ;;  %v392_v58 = vadd.f32 1.0, %v679_v56 }
  0xfc   : > { %v683_v59 = vpop.eup %682  ;;  %v396_v60 = vadd.f32 1.0, %v681_v57 }
  0xfd   : > { %v685_v61 = vpop.eup %684  ;;  %694 = vrcp.f32 %v392_v58  ;;  %v393_v62 = vadd.f32 1.0, %v683_v59 }
  0xfe   : > { %696 = vrcp.f32 %v396_v60  ;;  %v397_v63 = vadd.f32 1.0, %v685_v61 }
  0xff   : > { %698 = vrcp.f32 %v393_v62 }
 0x100   : > { %700 = vrcp.f32 %v397_v63 }
 0x105   : > { %v687_v0 = vpop.eup %686 }
 0x106   : > { %v689_v1 = vpop.eup %688  ;;  %v406_v4 = vmul.f32 %v687_v0, %v882_v16 }
 0x107   : > { %v691_v2 = vpop.eup %690  ;;  %v410_v6 = vmul.f32 %v689_v1, %v884_v17 }
 0x108   : > { %v693_v3 = vpop.eup %692  ;;  %v407_v5 = vmul.f32 %v691_v2, %v888_v22 }
 0x109   : > { %v411_v7 = vmul.f32 %v693_v3, %v890_v23 }
 0x10a   : > { %v695_v8 = vpop.eup %694  ;;  %v600_v9 = vpack.c.bf16 %v407_v5, %v406_v4 }
 0x10b   : > { %v697_v10 = vpop.eup %696  ;;  %v602_v11 = vpack.c.bf16 %v411_v7, %v410_v6  ;;  %v408_v14 = vmul.f32 %v695_v8, %v894_v32 }
 0x10c   : > { %v699_v12 = vpop.eup %698  ;;  %438 = vst [vmem:[%s229_s28] sm:$0xff] %v600_v9  ;;  %v412_v16 = vmul.f32 %v697_v10, %v896_v33 }
 0x10d   : > { %v701_v13 = vpop.eup %700  ;;  %440 = vst [vmem:[%s229_s28 + $0x10] sm:$0xff] %v602_v11  ;;  %v409_v15 = vmul.f32 %v699_v12, %v898_v38 }
 0x10e   : > { %v413_v17 = vmul.f32 %v701_v13, %v364_v41 }
 0x10f   : > { %v601_v18 = vpack.c.bf16 %v409_v15, %v408_v14 }
 0x110   : > { %v603_v19 = vpack.c.bf16 %v413_v17, %v412_v16 }
 0x111   : > { %439 = vst [vmem:[%s229_s28 + $0x8] sm:$0xff] %v601_v18 }
 0x112   : > { %441 = vst [vmem:[%s229_s28 + $0x18] sm:$0xff] %v603_v19 }
 0x113   : > { %715 = shalt.err (!%p712_p5)
}
 0x114   : > { %s716_s11 = scalar_lea.hbm %s919_s15, 512  ;;  %s720_s21 = scalar_lea.hbm %s971_s3, 1024 }
 0x115   : > { %p717_p6 = scmp.ne.s32.totalorder %s919_s15, %s716_s11  ;;  %p721_p10 = scmp.lt.s32.totalorder %s919_s15, %s971_s3 }
 0x116   : > { %p722_p11 = scmp.lt.s32.totalorder %s720_s21, %s716_s11 }
 0x117   : > { %p718_p7 = pnand %p717_p6, %p844_p4 }
 0x118   : > { %p723_p12 = por %p722_p11, %p721_p10 }
 0x119   : > { %p719_p9 = pneg %p718_p7 }
 0x11b   : > { %p724_p13 = pnand %p723_p12, %p719_p9 }
 0x11d   : > { %727 = shalt.err (!%p724_p13)
}
 0x11e   : > { %s782_s27 = smov 128   ;;  %s783_s28 = smov 8  }
 0x11f   : > { %607 = dma.vmem_to_hbm [thread:$0]  (%p844_p4), %s914_s29, 512, %s919_s15, %s923_s6, %s782_s27, %s782_s27, %s783_s28  }
 0x120 PF: > { %p613_p0 = scmp.ge.s32.totalorder %s778_s17, 2  ;;  %s476_s30 = sand.u32 1, %s758_s12  }
 0x121   : > { %s477_s4 = scalar_lea.sflag [#allocation3], %s476_s30 }
 0x122   : > { %p610_p1 = pnand %p613_p0, %p851_p8 }
 0x124   : > { %p611_p2 = pneg %p610_p1 }
 0x126   : > { %753 = dma.done.wait (%p611_p2), %s477_s4, 512  }
 0x127   : > { %755 = vsyncadd (%p611_p2), %s477_s4, 4294966784  ;;  %s16_s17 = sadd.s32 1, %s778_s17   ;;  %s974_s12 = smov %s762_s13 }
 0x128   : > { %p13_p3 = scmp.ge.s32.totalorder %s16_s17, 4   ;;  %s975_s13 = smov %s766_s14 }
 0x129   : > { %s976_s14 = smov %s857_s25  ;;  %s977_s15 = smov %s774_s16 }
 0x12a   : > { %s978_s16 = smov %s980_s20  ;;  %15 = sbr.rel (!%p13_p3) target bundleno = 4 (0x4), region = 73 }
 0x12f   :  { %482 = vsyncpa [#allocation3], 1 }
 0x130   :  { %484 = vsyncpa [#allocation3 + $0x1], 1 }

</bundles_post_ra>
